<compile_context>
chip_gen: v7x
topology: tpu7x:2x2x1
jax: 0.10.0
libtpu: 0.0.40
codegen_flags: <defaults>
</compile_context>

<pallas_src>
import jax
import jax.numpy as jnp
from jax.experimental import pallas as pl
from jax.experimental.pallas import tpu as pltpu


TILE_ROWS = 256     # multiple of 8 sublanes; amortizes per-grid-step overhead
LANE_COLS = 512     # multiple of 128 lanes -> lane-dense, unmasked stores


def _gaussian_kernel(a_ref, x_ref, o_ref):
    """a_ref: (1,1) f32 in SMEM; x_ref/o_ref: (tile_rows, LANE_COLS) in VMEM."""
    a = a_ref[0, 0]
    scale = -0.5 / (a * a)                        # scalar-unit math, done once/tile
    x = x_ref[...].astype(jnp.float32)            # keep VPU/EUP math in f32
    o_ref[...] = jnp.exp(x * x * scale).astype(o_ref.dtype)


def gaussian_activation_pallas(x, a, *, tile_rows=TILE_ROWS, lane_cols=LANE_COLS):
    """exp(-x**2 / (2*a**2)) for arbitrary-shaped x via a row-tiled Pallas kernel."""
    orig_shape, orig_dtype = x.shape, x.dtype
    n = x.size

    cols = lane_cols
    rows = -(-n // cols)                          # cdiv(n, cols)
    tr = min(tile_rows, max(rows, 1))             # row tile (== rows when small)
    rows_pad = -(-rows // tr) * tr                # rows a multiple of the row tile
    total = rows_pad * cols

    xf = jnp.pad(jnp.ravel(x), (0, total - n)).reshape(rows_pad, cols)
    a_smem = jnp.asarray(a, jnp.float32).reshape(1, 1)

    out = pl.pallas_call(
        _gaussian_kernel,
        out_shape=jax.ShapeDtypeStruct((rows_pad, cols), orig_dtype),
        grid=(rows_pad // tr,),
        in_specs=[
            pl.BlockSpec(memory_space=pltpu.MemorySpace.SMEM),   # scalar `a`
            pl.BlockSpec((tr, cols), lambda i: (i, 0)),          # x row tile
        ],
        out_specs=pl.BlockSpec((tr, cols), lambda i: (i, 0)),
        compiler_params=pltpu.CompilerParams(
            dimension_semantics=("parallel",),    # megacore sharding on v7x
            vmem_limit_bytes=32 * 1024 * 1024,
        ),
    )(a_smem, xf)

    return jnp.ravel(out)[:n].reshape(orig_shape)


def gaussian_activation_ref(x, a):
    a = jnp.asarray(a, jnp.float32).reshape(())
    return jnp.exp(-(x.astype(jnp.float32) ** 2) / (2.0 * a * a)).astype(x.dtype)


if __name__ == "__main__":
    key = jax.random.PRNGKey(0)
    k_x, _ = jax.random.split(key)

    # module init: self.a = nn.Parameter(1.0 * torch.ones(1))
    a_param = jnp.ones((1,), jnp.float32)
    x = jax.random.normal(k_x, (2, 4, 16, 16), jnp.float32) * 2.0

    out = jax.block_until_ready(gaussian_activation_pallas(x, a_param))
    ref = jax.block_until_ready(gaussian_activation_ref(x, a_param))

    assert out.shape == x.shape, out.shape
    assert bool(jnp.all(jnp.isfinite(out)))
    assert bool(jnp.allclose(out, ref, atol=1e-5, rtol=1e-5)), (
        float(jnp.max(jnp.abs(out - ref))))
    print("KERNEL_OK")
</pallas_src>

<mosaic_0001>
module attributes {stable_mosaic.version = 11 : i64} {
  func.func @_gaussian_kernel(%arg0: i32, %arg1: memref<1x1xf32, #tpu.memory_space<smem>>, %arg2: memref<4x512xf32, #tpu.memory_space<vmem>>, %arg3: memref<4x512xf32, #tpu.memory_space<vmem>>) attributes {dimension_semantics = [#tpu.dimension_semantics<parallel>], iteration_bounds = array<i64: 1>, scalar_prefetch = 0 : i64, scratch_operands = 0 : i64, tpu.core_type = #tpu.core_type<tc>, window_params = [{transform_indices = @transform_0, window_bounds = array<i64: 1, 1>}, {transform_indices = @transform_1, window_bounds = array<i64: 4, 512>}, {transform_indices = @transform_2, window_bounds = array<i64: 4, 512>}]} {
    %c0 = arith.constant 0 : index
    %c0_0 = arith.constant 0 : index
    %0 = memref.load %arg1[%c0, %c0_0] : memref<1x1xf32, #tpu.memory_space<smem>>
    %1 = arith.mulf %0, %0 : f32
    %cst = arith.constant -5.000000e-01 : f32
    %2 = arith.divf %cst, %1 : f32
    %c0_1 = arith.constant 0 : index
    %c0_2 = arith.constant 0 : index
    %3 = vector.load %arg2[%c0_1, %c0_2] : memref<4x512xf32, #tpu.memory_space<vmem>>, vector<4x512xf32>
    %4 = arith.mulf %3, %3 : vector<4x512xf32>
    %5 = vector.broadcast %2 : f32 to vector<4x512xf32>
    %6 = arith.mulf %4, %5 : vector<4x512xf32>
    %7 = math.exp %6 : vector<4x512xf32>
    %c0_3 = arith.constant 0 : index
    %c0_4 = arith.constant 0 : index
    %8 = vector.load %arg3[%c0_3, %c0_4] : memref<4x512xf32, #tpu.memory_space<vmem>>, vector<4x512xf32>
    tpu.vector_store %arg3[%c0_3, %c0_4], %7 {strides = array<i32>} : memref<4x512xf32, #tpu.memory_space<vmem>>, vector<4x512xf32>,
    return
  }
  func.func @transform_0(%arg0: i32) -> (i32, i32) {
    %c0_i32 = arith.constant 0 : i32
    %c0_i32_0 = arith.constant 0 : i32
    %c0_i32_1 = arith.constant 0 : i32
    return %c0_i32, %c0_i32_0 : i32, i32
  }
  func.func @transform_1(%arg0: i32) -> (i32, i32) {
    %c0_i32 = arith.constant 0 : i32
    %c0_i32_0 = arith.constant 0 : i32
    return %arg0, %c0_i32 : i32, i32
  }
  func.func @transform_2(%arg0: i32) -> (i32, i32) {
    %c0_i32 = arith.constant 0 : i32
    %c0_i32_0 = arith.constant 0 : i32
    return %arg0, %c0_i32 : i32, i32
  }
}

</mosaic_0001>

<bundles_post_ra>
// kernel: tpu_custom_call.1
= control target key start
LH: loop header
LB: loop body
LE: loop exit
PB: predicated region body
PF: predicated region fallthrough
CT: control target
= control target key end

     0   :  { %8 = vsyncpa [#allocation4], 0  ;;  %s162_s0 = inlined_call_operand.<no memory space> [shape: f32[1,1], index: 0, kind: input, shape index: {}]   ;;  %s163_s1 = inlined_call_operand.hbm [shape: f32[4,512], index: 1, kind: input, shape index: {}]   ;;  %s164_s2 = inlined_call_operand.hbm [shape: f32[4,512], index: 2, kind: output, shape index: {}]  }
   0x1   :  { %9 = vsyncpa [#allocation5], 0  ;;  %s117_s9 = smov [#allocation3]   ;;  %s69_s13 = scalar_lea.hbm %s163_s1, 256 }
   0x2   :  { %s18_s10 = sshll.u32 %s117_s9, 4  ;;  %p70_p0 = scmp.ne.s32.totalorder %s163_s1, %s69_s13  ;;  %s19_s10 = int_to_ptr.vmem [resolvable:$true] %s18_s10 }
   0x3   :  { %p73_p1 = scmp.lt.u32.totalorder %s69_s13, %s163_s1 }
   0x5   :  { %p75_p2 = pnand %p73_p1, %p70_p0 }
   0x7   :  { %78 = shalt.err (!%p75_p2)
}
   0x8   :  { %s79_s18 = scalar_lea.vmem %s19_s10, 256  ;;  %p84_p4 = scmp.lt.s32.totalorder %s19_s10, %s19_s10 }
   0x9   :  { %p80_p3 = scmp.ne.s32.totalorder %s19_s10, %s79_s18  ;;  %p85_p5 = scmp.lt.s32.totalorder %s79_s18, %s79_s18 }
   0xb   :  { %p86_p6 = por %p85_p5, %p84_p4 }
   0xd   :  { %p87_p7 = pnand %p86_p6, %p80_p3 }
   0xf   :  { %90 = shalt.err (!%p87_p7)
}
  0x10   :  { %21 = dma.hbm_to_vmem [thread:$0]  %s163_s1, 256, %s19_s10, [#allocation4]  }
  0x11   :  { %s26_s23 = smul.f32 %s162_s0, %s162_s0 }
  0x12   :  { %113 = dma.done.wait [#allocation4], 256  }
  0x13   :  { %114 = vsyncadd [#allocation4], 4294967040  ;;  %v27_v0 = vstv %s26_s23  ;;  %v31_v2 = vld [vmem:[#allocation3] sm:$0xff]  ;;  %v32_v3 = vld [vmem:[#allocation3 + $0x8] sm:$0xff]  ;;  %s118_s0 = smov [#allocation6]  }
  0x14   :  { %63 = vrcp.f32 %v27_v0  ;;  %v33_v4 = vmul.f32 %v31_v2, %v31_v2  ;;  %v34_v5 = vmul.f32 %v32_v3, %v32_v3  ;;  %s50_s1 = sshll.u32 %s118_s0, 4  ;;  %s51_s1 = int_to_ptr.vmem [resolvable:$true] %s50_s1 }
  0x15   :  { %s91_s26 = scalar_lea.vmem %s51_s1, 256  ;;  %p96_p9 = scmp.lt.s32.totalorder %s51_s1, %s51_s1 }
  0x16   :  { %p92_p8 = scmp.ne.s32.totalorder %s51_s1, %s91_s26  ;;  %p97_p10 = scmp.lt.s32.totalorder %s91_s26, %s91_s26 }
  0x18   :  { %p98_p11 = por %p97_p10, %p96_p9 }
  0x1a   :  { %p99_p12 = pnand %p98_p11, %p92_p8 }
  0x1e   :  { %v64_v1 = vpop.eup %63 }
  0x1f   :  { %59 = vpush %v64_v1 }
  0x50   :  { %s60_s24 = spop %59 }
  0x51   :  { %s30_s25 = smul.f32 -0.5, %s60_s24 }
  0x53   :  { %v35_v6 = vstv %s30_s25 }
  0x54   :  { %v36_v7 = vmul.f32 %v35_v6, %v33_v4  ;;  %v37_v8 = vmul.f32 %v35_v6, %v34_v5 }
  0x56   :  { %v38_v9 = vmul.f32 1.442695, %v36_v7  ;;  %v40_v10 = vmul.f32 1.442695, %v37_v8 }
  0x58   :  { %65 = vpow2.f32 %v38_v9 }
  0x59   :  { %67 = vpow2.f32 %v40_v10 }
  0x62   :  { %v66_v11 = vpop.eup %65 }
  0x63   :  { %v68_v12 = vpop.eup %67  ;;  %42 = vst [vmem:[#allocation6] sm:$0xff] %v66_v11 }
  0x64   :  { %43 = vst [vmem:[#allocation6 + $0x8] sm:$0xff] %v68_v12 }
  0x65   :  { %102 = shalt.err (!%p99_p12)
}
  0x66   :  { %s103_s29 = scalar_lea.hbm %s164_s2, 256 }
  0x67   :  { %p104_p13 = scmp.ne.s32.totalorder %s164_s2, %s103_s29  ;;  %p107_p0 = scmp.lt.u32.totalorder %s103_s29, %s164_s2 }
  0x69   :  { %p109_p1 = pnand %p107_p0, %p104_p13 }
  0x6b   :  { %112 = shalt.err (!%p109_p1)
}
  0x6c   :  { %53 = dma.vmem_to_hbm [thread:$0]  %s51_s1, 256, %s164_s2, [#allocation5]  }
  0x6d   :  { %115 = dma.done.wait [#allocation5], 256  }
  0x6e   :  { %116 = vsyncadd [#allocation5], 4294967040 }
  0x6f   :  { %57 = vsyncpa [#allocation4], 1 }
  0x70   :  { %58 = vsyncpa [#allocation5], 1 }

</bundles_post_ra>
